<compile_context>
chip_gen: v5e
topology: v5e:2x2
jax: 0.10.0
libtpu: 0.0.40
codegen_flags: <defaults>
</compile_context>

<pallas_src>
import functools

import jax
import jax.numpy as jnp
from jax.experimental import pallas as pl
from jax.experimental.pallas import tpu as pltpu


def _rmsnorm_kernel(x_ref, w_ref, o_ref, *, eps, inv_dim, low_precision):
    # x_ref: (tile_rows, dim) native dtype; w_ref: (1, dim); o_ref: (tile_rows, dim)
    x = x_ref[...]
    xf = x.astype(jnp.float32)
    # Sum-of-squares stays in f32 (XLU lane reduction); 1/dim folded into the
    # rsqrt argument (EUP slot, effectively free).
    ss = jnp.sum(xf * xf, axis=-1, keepdims=True)
    inv = jax.lax.rsqrt(ss * inv_dim + eps)            # f32 (tile_rows, 1)
    if low_precision:
        # bf16 scaling multiplies fed from the native-dtype read: no full f32
        # tile kept live across the body, half the VPU slot cost per element.
        o_ref[...] = ((x * inv.astype(x.dtype)) * w_ref[...]).astype(o_ref.dtype)
    else:
        # f32 path (f32 inputs, and any dtype without safe low-precision math).
        o_ref[...] = (w_ref[...] * (xf * inv)).astype(o_ref.dtype)


def _round_up(n, m):
    return -(-n // m) * m


def _vmem_capacity_bytes():
    try:
        info = pltpu.get_tpu_info()
        cap = int(getattr(info, "vmem_capacity_bytes", 0))
        if cap > 0:
            return cap
    except Exception:
        pass
    # Fallback keyed off device kind instead of a blanket conservative value.
    try:
        kind = jax.devices()[0].device_kind.lower()
    except Exception:
        kind = ""
    if "v7" in kind:
        return 64 * 1024 * 1024
    if "v5" in kind or "v6" in kind:
        return 128 * 1024 * 1024
    return 64 * 1024 * 1024


def _pick_tile_rows(rows, dim, itemsize, vmem_cap, x_buffers, out_buffers):
    # Sublane packing multiple for the input dtype.
    if itemsize >= 4:
        mult = 8
    elif itemsize == 2:
        mult = 16
    else:
        mult = 32

    # Generation-aware per-block target: bigger tiles where VMEM is plentiful
    # (v5e/v6e 128 MiB), moderate on v7x's 64 MiB per-TC VMEM (short ~2-3 us
    # steps are instead covered by deeper buffering).
    if vmem_cap >= 96 * 1024 * 1024:
        target_block_bytes = 12 * 1024 * 1024
    else:
        target_block_bytes = 6 * 1024 * 1024

    # VMEM per row: pipelined x + out buffers in native dtype plus ~2 short-
    # lived f32-sized temporaries inside the body. Stay under ~45% of VMEM.
    per_row_bytes = dim * ((x_buffers + out_buffers) * itemsize + 2 * 4)
    max_rows_by_vmem = max(mult, (int(0.45 * vmem_cap) // per_row_bytes) // mult * mult)

    tile_rows = max(mult, (target_block_bytes // (dim * itemsize)) // mult * mult)
    tile_rows = min(tile_rows, max_rows_by_vmem)
    tile_rows = min(tile_rows, _round_up(rows, mult))

    # Prefer >= 4 evenly sized grid steps when the problem is large enough so
    # both v7x TensorCores (and the pipeline) get balanced work — no forced
    # "2 steps with a ragged half" split.
    min_steps = 4
    if rows >= min_steps * mult and pl.cdiv(rows, tile_rows) < min_steps:
        tile_rows = max(mult, (rows // min_steps) // mult * mult)

    # Remainder-aware refinement: among nearby multiples of `mult`, minimize
    # wasted work in the ragged last block (prefer exact divisors of rows),
    # tie-breaking toward the larger tile.
    best, best_key = tile_rows, None
    lo = max(mult, (tile_rows // 2) // mult * mult)
    t = lo
    while t <= tile_rows:
        waste = pl.cdiv(rows, t) * t - rows
        key = (waste, -t)
        if best_key is None or key < best_key:
            best_key, best = key, t
        t += mult
    return best


def rmsnorm(x, weight, *, eps=1e-5, tile_rows=None):
    """RMSNorm over the last axis. x: (..., dim), weight: (dim,).

    Note: dim is expected to be a multiple of 128 (lane-dense). Other dims
    still compile (full-extent lane block) but incur masked lane stores.
    """
    orig_shape = x.shape
    dim = orig_shape[-1]
    x2 = x.reshape(-1, dim)              # contiguous: metadata-only reshape
    rows = x2.shape[0]
    itemsize = jnp.dtype(x.dtype).itemsize

    vmem_cap = _vmem_capacity_bytes()

    # bf16 scaling math only for bf16 inputs; f32 math everywhere else
    # (f32 inputs, v5e's f32-only VPU, exotic narrow dtypes).
    low_precision = x.dtype == jnp.bfloat16

    # Deeper x-buffering on small-VMEM parts (v7x) to hide per-step latency.
    deep_buffer = vmem_cap < 96 * 1024 * 1024
    x_buffers = 3 if deep_buffer else 2

    if tile_rows is None:
        tile_rows = _pick_tile_rows(rows, dim, itemsize, vmem_cap, x_buffers, 2)

    grid_steps = pl.cdiv(rows, tile_rows)
    grid = (grid_steps,)                 # ragged last block is masked by Pallas

    # Pre-cast weight once on the host side: native dtype for the bf16 path,
    # f32 for the f32 path — no per-grid-step cast inside the kernel.
    w_dtype = x.dtype if low_precision else jnp.float32
    w2 = weight.astype(w_dtype).reshape(1, dim)

    block_bytes = tile_rows * dim * itemsize
    est = ((x_buffers + 2) * block_bytes                     # x + out pipeline buffers
           + 2 * dim * jnp.dtype(w_dtype).itemsize           # weight
           + 2 * tile_rows * dim * 4)                        # transient f32 temporaries
    vmem_limit = int(min(max(2 * est, 16 * 1024 * 1024), 0.9 * vmem_cap))

    use_deep_pipeline = deep_buffer and grid_steps >= 3 and hasattr(pl, "Buffered")
    if use_deep_pipeline:
        x_spec = pl.BlockSpec((tile_rows, dim), lambda i: (i, 0),
                              pipeline_mode=pl.Buffered(3))
    else:
        x_spec = pl.BlockSpec((tile_rows, dim), lambda i: (i, 0))

    kernel = functools.partial(
        _rmsnorm_kernel, eps=float(eps), inv_dim=1.0 / float(dim),
        low_precision=low_precision)

    out = pl.pallas_call(
        kernel,
        out_shape=jax.ShapeDtypeStruct((rows, dim), x.dtype),
        grid_spec=pltpu.PrefetchScalarGridSpec(
            num_scalar_prefetch=0,
            grid=grid,
            in_specs=[
                x_spec,
                pl.BlockSpec((1, dim), lambda i: (0, 0)),
            ],
            out_specs=pl.BlockSpec((tile_rows, dim), lambda i: (i, 0)),
        ),
        compiler_params=pltpu.CompilerParams(
            dimension_semantics=("parallel",),
            vmem_limit_bytes=vmem_limit,
        ),
    )(x2, w2)

    return out.reshape(orig_shape)


def rmsnorm_ref(x, weight, eps=1e-5):
    xf = x.astype(jnp.float32)
    norm = jnp.sqrt(jnp.mean(xf * xf, axis=-1, keepdims=True) + eps)
    return (weight.astype(jnp.float32) * (xf / norm)).astype(x.dtype)


if __name__ == "__main__":
    key = jax.random.PRNGKey(0)
    batch, seq, dim = 2, 8, 128
    x = jax.random.normal(key, (batch, seq, dim), dtype=jnp.float32)
    # Deterministic weight init: nn.Parameter(torch.ones(dim))
    weight = jnp.ones((dim,), dtype=jnp.float32)

    # f32 path (exact against reference).
    out = jax.block_until_ready(rmsnorm(x, weight, eps=1e-5))
    ref = rmsnorm_ref(x, weight, eps=1e-5)
    assert out.shape == x.shape
    assert jnp.allclose(out, ref, atol=1e-5, rtol=1e-5), "f32 mismatch vs reference"

    # bf16 path (low-precision scaling multiplies) at bf16-appropriate tolerance.
    xb = x.astype(jnp.bfloat16)
    wb = weight.astype(jnp.bfloat16)
    outb = jax.block_until_ready(rmsnorm(xb, wb, eps=1e-5))
    refb = rmsnorm_ref(xb, wb, eps=1e-5).astype(jnp.float32)
    assert outb.shape == xb.shape
    assert jnp.allclose(outb.astype(jnp.float32), refb, atol=3e-2, rtol=3e-2), \
        "bf16 mismatch vs reference"

    print("KERNEL_OK")
</pallas_src>

<mosaic_0001>
module attributes {stable_mosaic.version = 11 : i64} {
  func.func @_rmsnorm_kernel(%arg0: i32, %arg1: memref<16x128xf32, #tpu.memory_space<vmem>>, %arg2: memref<1x128xf32, #tpu.memory_space<vmem>>, %arg3: memref<16x128xf32, #tpu.memory_space<vmem>>) attributes {dimension_semantics = [#tpu.dimension_semantics<parallel>], iteration_bounds = array<i64: 1>, scalar_prefetch = 0 : i64, scratch_operands = 0 : i64, tpu.core_type = #tpu.core_type<tc>, window_params = [{transform_indices = @transform_0, window_bounds = array<i64: 16, 128>}, {pipeline_mode = #tpu.pipeline_mode<synchronous>, transform_indices = @transform_1, window_bounds = array<i64: 1, 128>}, {transform_indices = @transform_2, window_bounds = array<i64: 16, 128>}]} {
    %c0 = arith.constant 0 : index
    %c0_0 = arith.constant 0 : index
    %0 = vector.load %arg1[%c0, %c0_0] : memref<16x128xf32, #tpu.memory_space<vmem>>, vector<16x128xf32>
    %1 = arith.mulf %0, %0 : vector<16x128xf32>
    %cst = arith.constant dense<0.000000e+00> : vector<16xf32>
    %2 = vector.multi_reduction <add>, %1, %cst [1] : vector<16x128xf32> to vector<16xf32>
    %3 = vector.shape_cast %2 : vector<16xf32> to vector<16x1xf32>
    %cst_1 = arith.constant 7.812500e-03 : f32
    %4 = vector.broadcast %cst_1 : f32 to vector<16x1xf32>
    %5 = arith.mulf %3, %4 : vector<16x1xf32>
    %cst_2 = arith.constant 9.99999974E-6 : f32
    %6 = vector.broadcast %cst_2 : f32 to vector<16x1xf32>
    %7 = arith.addf %5, %6 : vector<16x1xf32>
    %8 = math.rsqrt %7 : vector<16x1xf32>
    %c0_3 = arith.constant 0 : index
    %c0_4 = arith.constant 0 : index
    %9 = vector.load %arg2[%c0_3, %c0_4] : memref<1x128xf32, #tpu.memory_space<vmem>>, vector<1x128xf32>
    %10 = vector.broadcast %8 : vector<16x1xf32> to vector<16x128xf32>
    %11 = arith.mulf %0, %10 : vector<16x128xf32>
    %12 = vector.broadcast %9 : vector<1x128xf32> to vector<16x128xf32>
    %13 = arith.mulf %12, %11 : vector<16x128xf32>
    %c0_5 = arith.constant 0 : index
    %c0_6 = arith.constant 0 : index
    %14 = vector.load %arg3[%c0_5, %c0_6] : memref<16x128xf32, #tpu.memory_space<vmem>>, vector<16x128xf32>
    tpu.vector_store %arg3[%c0_5, %c0_6], %13 {strides = array<i32>} : memref<16x128xf32, #tpu.memory_space<vmem>>, vector<16x128xf32>,
    return
  }
  func.func @transform_0(%arg0: i32) -> (i32, i32) {
    %c0_i32 = arith.constant 0 : i32
    %c0_i32_0 = arith.constant 0 : i32
    return %arg0, %c0_i32 : i32, i32
  }
  func.func @transform_1(%arg0: i32) -> (i32, i32) {
    %c0_i32 = arith.constant 0 : i32
    %c0_i32_0 = arith.constant 0 : i32
    %c0_i32_1 = arith.constant 0 : i32
    return %c0_i32, %c0_i32_0 : i32, i32
  }
  func.func @transform_2(%arg0: i32) -> (i32, i32) {
    %c0_i32 = arith.constant 0 : i32
    %c0_i32_0 = arith.constant 0 : i32
    return %arg0, %c0_i32 : i32, i32
  }
}

</mosaic_0001>

<bundles_post_ra>
// kernel: tpu_custom_call.1
= control target key start
LH: loop header
LB: loop body
LE: loop exit
PB: predicated region body
PF: predicated region fallthrough
CT: control target
= control target key end

     0   :  { %7 = vsyncpa [#allocation3], 0  ;;  %s227_s0 = inlined_call_operand.hbm [shape: f32[16,128], index: 0, kind: input, shape index: {}]   ;;  %s228_s1 = inlined_call_operand.hbm [shape: f32[1,128], index: 1, kind: input, shape index: {}]   ;;  %s229_s2 = inlined_call_operand.hbm [shape: f32[16,128], index: 2, kind: output, shape index: {}]  }
   0x1   :  { %8 = vsyncpa [#allocation6], 0 }
   0x2   :  { %9 = vsyncpa [#allocation4], 0  ;;  %s14_s11 = sshll.u32 %s227_s0, 4  ;;  %s192_s12 = smov [#allocation2]   ;;  %s15_s11 = int_to_ptr.hbm [resolvable:$true] %s14_s11 }
   0x3   :  { %s16_s13 = sshll.u32 %s192_s12, 4  ;;  %s28_s16 = sshll.u32 %s228_s1, 4  ;;  %s17_s13 = int_to_ptr.vmem [resolvable:$true] %s16_s13  ;;  %s29_s16 = int_to_ptr.hbm [resolvable:$true] %s28_s16 }
   0x4   :  { %s193_s17 = smov 128   ;;  %s194_s18 = smov 8  }
   0x5   :  { %22 = dma.hbm_to_vmem [thread:$0]  %s15_s11, 256, %s17_s13, [#allocation3], %s193_s17, %s193_s17, %s194_s18  }
   0x6   :  { %s195_s19 = smov [#allocation5]  }
   0x7   :  { %s30_s20 = sshll.u32 %s195_s19, 4  ;;  %s31_s20 = int_to_ptr.vmem [resolvable:$true] %s30_s20 }
   0x8   :  { %33 = dma.hbm_to_vmem [thread:$0]  %s29_s16, 16, %s31_s20, [#allocation6]  }
   0x9   :  { %186 = dma.done.wait [#allocation3], 256  }
   0xa   :  { %187 = vsyncadd [#allocation3], 4294967040 }
   0xb   :  { %188 = dma.done.wait [#allocation6], 16  }
   0xc   :  { %189 = vsyncadd [#allocation6], 4294967280  ;;  %v42_v0 = vld [vmem:[#allocation2] sm:$0xff]  ;;  %v43_v2 = vld [vmem:[#allocation2 + $0x8] sm:$0xff]  ;;  %s196_s0 = smov [#allocation7]   ;;  %s90_s23 = sshll.u32 %s229_s2, 4  ;;  %s91_s23 = int_to_ptr.hbm [resolvable:$true] %s90_s23 }
   0xd   :  { %v44_v1 = vmul.f32 %v42_v0, %v42_v0  ;;  %v45_v3 = vmul.f32 %v43_v2, %v43_v2  ;;  %v109_v18 = vld [vmem:[#allocation5] ss:$0 sm:$0xff]  ;;  %s88_s1 = sshll.u32 %s196_s0, 4  ;;  %s89_s1 = int_to_ptr.vmem [resolvable:$true] %s88_s1 }
   0xf   :  { %46 = vadd.xlane.f32.xlu0 %v44_v1 }
  0x17   :  { %48 = vadd.xlane.f32.xlu0 %v45_v3 }
  0x82   :  { %v47_v4 = vpop.xlane.xlu0 %46 }
  0x83   :  { %v50_v5 = vmul.f32 0.0078125, %v47_v4 }
  0x85   :  { %v52_v6 = vadd.f32 1e-05, %v50_v5 }
  0x87   :  { %110 = vrsqrt.f32 %v52_v6  ;;  %vm60_vm1 = vweird.f32 %v52_v6 }
  0x8a   :  { %v49_v7 = vpop.xlane.xlu0 %48 }
  0x8b   :  { %v51_v8 = vmul.f32 0.0078125, %v49_v7 }
  0x8d   :  { %v111_v9 = vpop.eup %110  ;;  %v53_v10 = vadd.f32 1e-05, %v51_v8 }
  0x8e   :  { %v55_v11 = vmul.f32 %v111_v9, %v52_v6  ;;  %vm61_vm0 = vweird.f32 %v111_v9 }
  0x8f   :  { %112 = vrsqrt.f32 %v53_v10  ;;  %vm62_vm2 = vmor %vm60_vm1, %vm61_vm0  ;;  %vm70_vm4 = vweird.f32 %v53_v10 }
  0x90   :  { %v56_v12 = vmul.f32 %v111_v9, %v55_v11 }
  0x92   :  { %v57_v13 = vmul.f32 0.5, %v56_v12 }
  0x94   :  { %v58_v14 = vsub.f32 1.5, %v57_v13 }
  0x95   :  { %v113_v15 = vpop.eup %112 }
  0x96   :  { %v59_v16 = vmul.f32 %v111_v9, %v58_v14  ;;  %v65_v17 = vmul.f32 %v113_v15, %v53_v10  ;;  %vm71_vm3 = vweird.f32 %v113_v15 }
  0x97   :  { %vm72_vm5 = vmor %vm70_vm4, %vm71_vm3 }
  0x98   :  { %v63_v19 = vsel %vm62_vm2, %v111_v9, %v59_v16  ;;  %v66_v20 = vmul.f32 %v113_v15, %v65_v17 }
  0x99   :  { %v75_v21 = vmul.f32 %v63_v19, %v42_v0 }
  0x9a   :  { %v67_v22 = vmul.f32 0.5, %v66_v20 }
  0x9b   :  { %v80_v23 = vmul.f32 %v109_v18, %v75_v21 }
  0x9c   :  { %v68_v24 = vsub.f32 1.5, %v67_v22 }
  0x9d   :  { %82 = vst [vmem:[#allocation7] sm:$0xff] %v80_v23 }
  0x9e   :  { %v69_v25 = vmul.f32 %v113_v15, %v68_v24 }
  0xa0   :  { %v73_v26 = vsel %vm72_vm5, %v113_v15, %v69_v25 }
  0xa1   :  { %v76_v27 = vmul.f32 %v73_v26, %v43_v2 }
  0xa3   :  { %v81_v28 = vmul.f32 %v109_v18, %v76_v27 }
  0xa5   :  { %83 = vst [vmem:[#allocation7 + $0x8] sm:$0xff] %v81_v28 }
  0xa6   :  { %96 = dma.vmem_to_hbm [thread:$0]  %s89_s1, 256, %s91_s23, [#allocation4], %s193_s17, %s193_s17, %s194_s18  }
  0xa7   :  { %190 = dma.done.wait [#allocation4], 256  }
  0xa8   :  { %191 = vsyncadd [#allocation4], 4294967040 }
  0xa9   :  { %101 = vsyncpa [#allocation3], 1 }
  0xaa   :  { %102 = vsyncpa [#allocation6], 1 }
  0xab   :  { %103 = vsyncpa [#allocation4], 1 }

</bundles_post_ra>
